<compile_context>
chip_gen: v5e
topology: v5e:2x2
jax: 0.10.0
libtpu: 0.0.40
codegen_flags: <defaults>
</compile_context>

<pallas_src>
import jax
import jax.numpy as jnp
from jax.experimental import pallas as pl
from jax.experimental.pallas import tpu as pltpu


def _pool_sum_kernel(u_ref, sum_ref):
    """Accumulate the per-channel spatial sum of one (1, C, TS) tile."""
    @pl.when(pl.program_id(1) == 0)
    def _():
        sum_ref[...] = jnp.zeros_like(sum_ref)

    part = jnp.sum(u_ref[...].astype(jnp.float32), axis=-1)   # (1, C)
    sum_ref[...] += part[:, None, :]                           # (1, 1, C)


def _scale_kernel(gate_ref, u_ref, o_ref):
    """out = U * gate, gate broadcast over the spatial (lane) axis."""
    o_ref[...] = u_ref[...] * gate_ref[...]                    # (1,C,TS)*(1,C,1)


def _choose_tile(S, C, itemsize, target_bytes=2 * 1024 * 1024):
    """Largest lane-dense (multiple-of-128) spatial tile under a VMEM budget."""
    ts = max(128, (target_bytes // max(1, C * itemsize)) // 128 * 128)
    s_pad128 = -(-S // 128) * 128
    ts = min(ts, s_pad128)
    s_padded = -(-S // ts) * ts
    return ts, s_padded


def cse_forward(U, w_squeeze, w_excite):
    """U: (N, C, D, H, W); w_squeeze: (C//2, C); w_excite: (C, C//2)."""
    N, C, D, H, W = U.shape
    S = D * H * W
    itemsize = jnp.dtype(U.dtype).itemsize
    ts, s_padded = _choose_tile(S, C, itemsize)
    n_tiles = s_padded // ts

    u_flat = U.reshape(N, C, S)
    if s_padded != S:
        # Zero padding: does not perturb the sum; padded lanes are sliced off
        # again after the scale pass.
        u_flat = jnp.pad(u_flat, ((0, 0), (0, 0), (0, s_padded - S)))

    vmem_limit = 32 * 1024 * 1024
    bytes_u = N * C * s_padded * itemsize

    # ---- Pass 1: pooled spatial sum per (n, c) -------------------------------
    pooled_sum = pl.pallas_call(
        _pool_sum_kernel,
        out_shape=jax.ShapeDtypeStruct((N, 1, C), jnp.float32),
        grid_spec=pltpu.PrefetchScalarGridSpec(
            num_scalar_prefetch=0,
            grid=(N, n_tiles),
            in_specs=[pl.BlockSpec((1, C, ts), lambda n, s: (n, 0, s))],
            out_specs=pl.BlockSpec((1, 1, C), lambda n, s: (n, 0, 0)),
        ),
        compiler_params=pltpu.CompilerParams(
            dimension_semantics=("parallel", "arbitrary"),
            vmem_limit_bytes=vmem_limit),
        cost_estimate=pl.CostEstimate(
            flops=N * C * s_padded,
            transcendentals=0,
            bytes_accessed=bytes_u + N * C * 4),
    )(u_flat)

    # ---- Gate: two 1x1x1 convs + sigmoid, batched over N in plain JAX --------
    # (No nonlinearity between the two convs in this module, matching the
    #  PyTorch forward; doing them here keeps the tiny M=N matmuls off the
    #  kernel's MXU path.)
    z = pooled_sum[:, 0, :] * (1.0 / S)                        # true-S mean, (N, C)
    z1 = jnp.dot(z, w_squeeze.T.astype(jnp.float32),
                 preferred_element_type=jnp.float32)           # (N, C//2)
    z2 = jnp.dot(z1, w_excite.T.astype(jnp.float32),
                 preferred_element_type=jnp.float32)           # (N, C)
    gate = jax.nn.sigmoid(z2).astype(U.dtype).reshape(N, C, 1)

    # ---- Pass 2: lane-dense broadcast multiply -------------------------------
    out_flat = pl.pallas_call(
        _scale_kernel,
        out_shape=jax.ShapeDtypeStruct((N, C, s_padded), U.dtype),
        grid_spec=pltpu.PrefetchScalarGridSpec(
            num_scalar_prefetch=0,
            grid=(N, n_tiles),
            in_specs=[
                pl.BlockSpec((1, C, 1), lambda n, s: (n, 0, 0)),    # gate
                pl.BlockSpec((1, C, ts), lambda n, s: (n, 0, s)),   # U tile
            ],
            out_specs=pl.BlockSpec((1, C, ts), lambda n, s: (n, 0, s)),
        ),
        compiler_params=pltpu.CompilerParams(
            dimension_semantics=("parallel", "parallel"),
            vmem_limit_bytes=vmem_limit),
        cost_estimate=pl.CostEstimate(
            flops=N * C * s_padded,
            transcendentals=0,
            bytes_accessed=2 * bytes_u + N * C * itemsize),
    )(gate, u_flat)

    return out_flat[:, :, :S].reshape(N, C, D, H, W)


def _reference(U, w_squeeze, w_excite):
    z = jnp.mean(U.astype(jnp.float32), axis=(2, 3, 4))        # (N, C)
    z1 = z @ w_squeeze.T                                       # (N, C//2)
    z2 = z1 @ w_excite.T                                       # (N, C)
    gate = jax.nn.sigmoid(z2).astype(U.dtype)[:, :, None, None, None]
    return U * gate


if __name__ == "__main__":
    key = jax.random.PRNGKey(0)
    k_u, k_w1, k_w2, k_u2 = jax.random.split(key, 4)

    # Case 1: S = D*H*W is already a multiple of 128.
    N, C, D, H, W = 2, 4, 8, 8, 8
    U = jax.random.normal(k_u, (N, C, D, H, W), dtype=jnp.float32)
    # Conv3d(C, C//2, k=1, bias=False) weight (C//2, C, 1, 1, 1) -> (C//2, C).
    w_squeeze = jax.random.normal(k_w1, (C // 2, C), dtype=jnp.float32) * 0.5
    # Conv3d(C//2, C, k=1, bias=False) weight (C, C//2, 1, 1, 1) -> (C, C//2).
    w_excite = jax.random.normal(k_w2, (C, C // 2), dtype=jnp.float32) * 0.5

    out = jax.block_until_ready(cse_forward(U, w_squeeze, w_excite))
    ref = _reference(U, w_squeeze, w_excite)
    assert out.shape == (N, C, D, H, W)
    assert jnp.allclose(out, ref, atol=1e-5, rtol=1e-5), "mismatch (case 1)"

    # Case 2: ragged spatial extent (exercises zero-padding + true-S mean).
    D2, H2, W2 = 5, 6, 7
    U2 = jax.random.normal(k_u2, (N, C, D2, H2, W2), dtype=jnp.float32)
    out2 = jax.block_until_ready(cse_forward(U2, w_squeeze, w_excite))
    ref2 = _reference(U2, w_squeeze, w_excite)
    assert out2.shape == (N, C, D2, H2, W2)
    assert jnp.allclose(out2, ref2, atol=1e-5, rtol=1e-5), "mismatch (case 2)"

    print("KERNEL_OK")
</pallas_src>

<mosaic_0001>
module attributes {stable_mosaic.version = 11 : i64} {
  func.func @_pool_sum_kernel(%arg0: i32, %arg1: i32, %arg2: memref<1x4x512xf32, #tpu.memory_space<vmem>>, %arg3: memref<1x1x4xf32, #tpu.memory_space<vmem>>) attributes {dimension_semantics = [#tpu.dimension_semantics<parallel>, #tpu.dimension_semantics<arbitrary>], iteration_bounds = array<i64: 2, 1>, scalar_prefetch = 0 : i64, scratch_operands = 0 : i64, tpu.core_type = #tpu.core_type<tc>, window_params = [{transform_indices = @transform_0, window_bounds = array<i64: 1, 4, 512>}, {transform_indices = @transform_1, window_bounds = array<i64: 1, 1, 4>}]} {
    %c0_i32 = arith.constant 0 : i32
    %0 = arith.cmpi eq, %arg1, %c0_i32 : i32
    %1 = arith.extui %0 : i1 to i32
    %c0_i32_0 = arith.constant 0 : i32
    %2 = arith.cmpi ne, %1, %c0_i32_0 : i32
    scf.if %2 {
      %cst_9 = arith.constant 0.000000e+00 : f32
      %9 = vector.broadcast %cst_9 : f32 to vector<1x1x4xf32>
      %c0_10 = arith.constant 0 : index
      %c0_11 = arith.constant 0 : index
      %c0_12 = arith.constant 0 : index
      %10 = vector.load %arg3[%c0_10, %c0_11, %c0_12] : memref<1x1x4xf32, #tpu.memory_space<vmem>>, vector<1x1x4xf32>
      tpu.vector_store %arg3[%c0_10, %c0_11, %c0_12], %9 {strides = array<i32>} : memref<1x1x4xf32, #tpu.memory_space<vmem>>, vector<1x1x4xf32>,
    } else {
    }
    %c0 = arith.constant 0 : index
    %c0_1 = arith.constant 0 : index
    %c0_2 = arith.constant 0 : index
    %3 = vector.load %arg2[%c0, %c0_1, %c0_2] : memref<1x4x512xf32, #tpu.memory_space<vmem>>, vector<1x4x512xf32>
    %cst = arith.constant dense<0.000000e+00> : vector<1x4xf32>
    %4 = vector.multi_reduction <add>, %3, %cst [2] : vector<1x4x512xf32> to vector<1x4xf32>
    %c0_3 = arith.constant 0 : index
    %c0_4 = arith.constant 0 : index
    %c0_5 = arith.constant 0 : index
    %5 = vector.load %arg3[%c0_3, %c0_4, %c0_5] : memref<1x1x4xf32, #tpu.memory_space<vmem>>, vector<1x1x4xf32>
    %6 = vector.shape_cast %4 : vector<1x4xf32> to vector<1x1x4xf32>
    %7 = arith.addf %5, %6 : vector<1x1x4xf32>
    %c0_6 = arith.constant 0 : index
    %c0_7 = arith.constant 0 : index
    %c0_8 = arith.constant 0 : index
    %8 = vector.load %arg3[%c0_6, %c0_7, %c0_8] : memref<1x1x4xf32, #tpu.memory_space<vmem>>, vector<1x1x4xf32>
    tpu.vector_store %arg3[%c0_6, %c0_7, %c0_8], %7 {strides = array<i32>} : memref<1x1x4xf32, #tpu.memory_space<vmem>>, vector<1x1x4xf32>,
    return
  }
  func.func @transform_0(%arg0: i32, %arg1: i32) -> (i32, i32, i32) {
    %c0_i32 = arith.constant 0 : i32
    %c0_i32_0 = arith.constant 0 : i32
    return %arg0, %c0_i32, %arg1 : i32, i32, i32
  }
  func.func @transform_1(%arg0: i32, %arg1: i32) -> (i32, i32, i32) {
    %c0_i32 = arith.constant 0 : i32
    %c0_i32_0 = arith.constant 0 : i32
    %c0_i32_1 = arith.constant 0 : i32
    return %arg0, %c0_i32, %c0_i32_0 : i32, i32, i32
  }
}

</mosaic_0001>

<bundles_post_ra>
// kernel: tpu_custom_call.1
= control target key start
LH: loop header
LB: loop body
LE: loop exit
PB: predicated region body
PF: predicated region fallthrough
CT: control target
= control target key end

     0   :  { %6 = vsyncpa [#allocation3], 0  ;;  %s622_s0 = inlined_call_operand.hbm [shape: f32[2,4,512], index: 0, kind: input, shape index: {}]   ;;  %s623_s1 = inlined_call_operand.hbm [shape: f32[2,1,4], index: 1, kind: output, shape index: {}]  }
   0x1   :  { %8 = vsyncpa [#allocation3 + $0x1], 0 }
   0x2   :  { %9 = vsyncpa [#allocation4], 0 }
   0x3   :  { %11 = vsyncpa [#allocation4 + $0x1], 0  ;;  %s499_s6 = smov 0   ;;  %s501_s7 = smov 0  }
   0x4   :  { %s503_s8 = smov 0   ;;  %s505_s9 = smov 0  }
   0x5   :  { %s507_s10 = smov 0   ;;  %s509_s11 = smov 0  }
   0x6 LB: > { %s296_s12 = sadd.s32 4294967295, %s485_s11   ;;  %s297_s13 = sadd.s32 4294967294, %s485_s11   ;;  %s485_s11 = sphi %s509_s11, %s17_s11   ;;  %s481_s10 = sphi %s507_s10, %s632_s10   ;;  %s477_s9 = sphi %s505_s9, %s631_s9   ;;  %s473_s8 = sphi %s503_s8, %s630_s8   ;;  %s469_s7 = sphi %s501_s7, %s629_s7   ;;  %s465_s6 = sphi %s499_s6, %s628_s6  }
   0x7   : > { %s29_s14 = sadd.s32 1, %s481_s10  ;;  %s38_s15 = sadd.s32 1, %s473_s8 }
   0x8   : > { %p31_p0 = scmp.ge.s32.totalorder %s29_s14, 2  ;;  %p45_p1 = scmp.ne.s32.totalorder %s473_s8, %s469_s7 }
   0x9   : > { %p46_p2 = scmp.eq.s32.totalorder %s485_s11, 0  ;;  %p51_p3 = scmp.ne.s32.totalorder %s469_s7, %s465_s6 }
   0xa   : > { %s634_s14 = smov (%p31_p0, %s29_s14), 0  ;;  %p52_p5 = scmp.eq.s32.totalorder %s296_s12, 0 }
   0xb   : > { %p540_p4 = por %p46_p2, %p45_p1  ;;  %s33_s17 = ssub.s32 %s481_s10, %s634_s14 }
   0xc   : > { %p75_p6 = scmp.eq.s32.totalorder %s296_s12, 1  ;;  %p36_p7 = scmp.eq.s32.totalorder %s33_s17, 0 }
   0xd   : > { %p546_p8 = por %p52_p5, %p51_p3  ;;  %p81_p10 = scmp.eq.s32.totalorder %s297_s13, 1 }
   0xe   : > { %p550_p9 = por %p75_p6, %p45_p1  ;;  %p299_p12 = scmp.ge.s32.totalorder %s485_s11, 2 }
   0xf   : > { %s555_s20 = scalar_select %p36_p7, %s473_s8, %s38_s15  }
  0x10   : > { %p557_p11 = por %p81_p10, %p51_p3  ;;  %p320_p13 = scmp.lt.s32.totalorder %s485_s11, 2 }
  0x11   : > { %s101_s22 = sand.u32 1, %s473_s8   ;;  %s307_s24 = sshll.u32 %s481_s10, 4 }
  0x12   : > { %s300_s23 = sshll.u32 %s101_s22, 4  ;;  %s112_s27 = scalar_lea.hbm %s622_s0, %s307_s24 }
  0x13   : > { %s105_s28 = scalar_lea.vmem [#allocation2], %s300_s23  ;;  %s114_s30 = sshll.u32 %s112_s27, 4  ;;  %s115_s30 = int_to_ptr.hbm [resolvable:$true] %s114_s30 }
  0x14   : > { %s116_s29 = sshll.u32 %s105_s28, 4  ;;  %p313_p0 = pnand %p320_p13, %p540_p4  ;;  %s117_s29 = int_to_ptr.vmem [resolvable:$true] %s116_s29 }
  0x15   : > { %p303_p1 = scmp.ge.s32.totalorder %s485_s11, 1  ;;  %p121_p2 = scmp.lt.s32.totalorder %s485_s11, 3 }
  0x16   : > { %s102_s2 = scalar_lea.sflag [#allocation3], %s101_s22 }
  0x17   : > { %315 = dma.hbm_to_vmem [thread:$0]  (!%p313_p0), %s115_s30, 256, %s117_s29, %s102_s2  }
  0x18   : > { %p122_p3 = pnand %p303_p1, %p121_p2 }
  0x19   : > { %s573_s3 = sand.u32 (!%p122_p3), 1, %s469_s7  }
  0x1a   : > { %125 = sbr.rel (%p122_p3) target bundleno = 300 (0x12c), region = 24  ;;  %s304_s4 = sshll.u32 (!%p122_p3), %s573_s3, 4 }
  0x1b   : > { %s128_s5 = scalar_lea.sflag (!%p122_p3), [#allocation3], %s573_s3  ;;  %s131_s12 = scalar_lea.vmem (!%p122_p3), [#allocation2], %s304_s4 }
  0x1f   : > { %456 = dma.done.wait (%p546_p8), %s128_s5, 256  }
  0x20   : > { %458 = vsyncadd (%p546_p8), %s128_s5, 4294967040  ;;  %v157_v0 = vld [vmem:[%s131_s12] sm:$0xff]  ;;  %v158_v1 = vld [vmem:[%s131_s12 + $0x8] sm:$0xff]  ;;  %vm172_vm0 = vcmask 1043456   ;;  %v487_v13 = vmov 0   ;;  %vm155_vm1 = vcmask 24576   ;;  %v199_v21 = vlaneseq  ;;  %s215_s17 = scalar_lea.hbm %s623_s1, %s477_s9 }
  0x21   : > { %161 = vst [vmem:[#allocation1] ss:$2 sm:$0xff] %v157_v0  ;;  %372 = vset.pattern.permute.xlu0 %v487_v13  ;;  %s149_s13 = scalar_lea.vmem [#allocation5], %s573_s3  ;;  %v488_v14 = vmov 0.0   ;;  %s219_s22 = sshll.u32 %s215_s17, 4  ;;  %s220_s22 = int_to_ptr.hbm [resolvable:$true] %s219_s22 }
  0x22   : > { %163 = vst [vmem:[#allocation1 + $0x10] ss:$2 sm:$0xff] %v158_v1  ;;  %v200_v22 = vand.u32 127, %v199_v21  ;;  %s217_s18 = sshll.u32 %s149_s13, 4  ;;  %s207_s23 = scalar_lea.sflag [#allocation4], %s573_s3  ;;  %s218_s18 = int_to_ptr.vmem [resolvable:$true] %s217_s18 }
  0x23   : > { %156 = vst.msk [vmem:[%s149_s13] sm:$0x1] %vm155_vm1, %v488_v14  ;;  %s417_s24 = sshra.s32 %s220_s22, 4  ;;  %s423_s27 = scalar_lea.hbm %s623_s1, 2  ;;  %s418_s24 = int_to_ptr.hbm [resolvable:$true] %s417_s24 }
  0x24   : > { %s419_s25 = scalar_lea.hbm %s418_s24, 1  ;;  %p424_p7 = scmp.lt.s32.totalorder %s418_s24, %s623_s1 }
  0x25   : > { %p420_p4 = scmp.ne.s32.totalorder %s418_s24, %s419_s25  ;;  %p425_p8 = scmp.lt.s32.totalorder %s423_s27, %s419_s25 }
  0x27   : > { %p421_p5 = pnand %p420_p4, %p550_p9  ;;  %p426_p10 = por %p425_p8, %p424_p7 }
  0x28   : > { %v164_v2 = vld.sshfl [vmem:[#allocation1] sm:$0xff pattern:$0x75316420]  ;;  %v165_v3 = vld.sshfl [vmem:[#allocation1 + $0x8] sm:$0xff pattern:$0x75316420] }
  0x29   : > { %v166_v4 = vld.sshfl [vmem:[#allocation1 + $0x10] sm:$0xff pattern:$0x75316420]  ;;  %v167_v5 = vld.sshfl [vmem:[#allocation1 + $0x18] sm:$0xff pattern:$0x75316420]  ;;  %p422_p6 = pneg %p421_p5 }
  0x2a   : > { %v173_v6 = vsel %vm172_vm0, %v164_v2, 0.0  ;;  %v174_v7 = vsel %vm172_vm0, %v165_v3, 0.0  ;;  %v176_v8 = vsel %vm172_vm0, %v166_v4, 0.0  ;;  %v178_v10 = vsel %vm172_vm0, %v167_v5, 0.0  ;;  %v182_v24 = vld [vmem:[%s149_s13] sm:$0x1] }
  0x2b   : > { %v175_v9 = vadd.f32 %v174_v7, %v173_v6  ;;  %p427_p13 = pnand %p426_p10, %p422_p6 }
  0x2d   : > { %v177_v11 = vadd.f32 %v176_v8, %v175_v9 }
  0x2f   : > { %v179_v12 = vadd.f32 %v178_v10, %v177_v11 }
  0x31   : > { %180 = vadd.xlane.f32.xlu0 %v179_v12 }
  0xa4   : > { %v181_v15 = vpop.xlane.xlu0 %180 }
  0xa5   : > { %v184_v16 = vperm.slane %v181_v15, 0  ;;  %v185_v17 = vperm.slane %v181_v15, 1  ;;  %v186_v18 = vperm.slane %v181_v15, 2  ;;  %v187_v19 = vperm.slane %v181_v15, 3 }
  0xa7   : > { %188 = vst [vmem:[#allocation1] ss:$9 sm:$0xff] %v184_v16 }
  0xa8   : > { %190 = vst [vmem:[#allocation1 + $0x1] ss:$9 sm:$0xff] %v185_v17 }
  0xa9   : > { %192 = vst [vmem:[#allocation1 + $0x2] ss:$9 sm:$0xff] %v186_v18 }
  0xaa   : > { %194 = vst [vmem:[#allocation1 + $0x3] ss:$9 sm:$0xff] %v187_v19 }
  0xb1   : > { %v195_v20 = vld [vmem:[#allocation1] sm:$0xff] }
  0xb2   : > { %197 = vperm.xlu0 %372, %v195_v20  }
 0x124   : > { %v198_v23 = vpop.permute.xlu0 %197 }
 0x125   : > { %v201_v25 = vperm.slane %v198_v23, %v200_v22 }
 0x127   : > { %v203_v26 = vadd.f32 %v201_v25, %v182_v24 }
 0x129   : > { %205 = vst.msk [vmem:[%s149_s13] sm:$0x1] %vm155_vm1, %v203_v26 }
 0x12a   : > { %430 = shalt.err (!%p427_p13)
}
 0x12b   : > { %310 = dma.vmem_to_hbm [thread:$0]  (%p550_p9), %s218_s18, 16, %s220_s22, %s207_s23  }
 0x12c PF: > { %s231_s30 = sand.u32 1, %s465_s6   ;;  %p317_p0 = pnand %p299_p12, %p557_p11 }
 0x12d   : > { %s232_s2 = scalar_lea.sflag [#allocation4], %s231_s30 }
 0x12e   : > { %p318_p1 = pneg %p317_p0 }
 0x130   : > { %460 = dma.done.wait (%p318_p1), %s232_s2, 16  }
 0x131   : > { %462 = vsyncadd (%p318_p1), %s232_s2, 4294967280  ;;  %s17_s11 = sadd.s32 1, %s485_s11   ;;  %s628_s6 = smov %s469_s7 }
 0x132   : > { %p14_p2 = scmp.ge.s32.totalorder %s17_s11, 4   ;;  %s629_s7 = smov %s473_s8 }
 0x133   : > { %s630_s8 = smov %s555_s20  ;;  %s631_s9 = smov %s481_s10 }
 0x134   : > { %s632_s10 = smov %s634_s14  ;;  %16 = sbr.rel (!%p14_p2) target bundleno = 6 (0x6), region = 77 }
 0x139   :  { %237 = vsyncpa [#allocation3], 1 }
 0x13a   :  { %239 = vsyncpa [#allocation3 + $0x1], 1 }
 0x13b   :  { %240 = vsyncpa [#allocation4], 1 }
 0x13c   :  { %242 = vsyncpa [#allocation4 + $0x1], 1 }

</bundles_post_ra>
